<compile_context>
chip_gen: v6e
topology: v6e:2x2x1
jax: 0.10.0
libtpu: 0.0.40
codegen_flags: <defaults>
</compile_context>

<pallas_src>
import math

import jax
import jax.numpy as jnp
from jax.experimental import pallas as pl
from jax.experimental.pallas import tpu as pltpu  # noqa: F401  (TPU backend parity)

# ---------------- model hyper-parameters (small, consistent with the module) ---
B = 2          # batch
N = 8          # sequence length
D = 32         # query_dim
HEADS = 4
DIM_HEAD = 16
INNER = HEADS * DIM_HEAD    # 64
HIDDEN = 4 * D              # 128
BN = B * N                  # 16 rows after folding batch into sequence
LN_EPS = 1e-5
SCALE = DIM_HEAD ** (-0.5)
INV_SQRT2 = 1.0 / math.sqrt(2.0)

# rows of the packed (8, 128) vector operand
ROW_LN1_G, ROW_LN1_B, ROW_BP, ROW_LN2_G, ROW_LN2_B, ROW_B2, ROW_B1 = range(7)


def _layer_norm(x, gamma, beta):
    # torch.nn.LayerNorm: biased variance over last dim, eps inside rsqrt
    mu = jnp.mean(x, axis=-1, keepdims=True)
    var = jnp.mean((x - mu) ** 2, axis=-1, keepdims=True)
    return (x - mu) * jax.lax.rsqrt(var + LN_EPS) * gamma + beta


def block_kernel(x_ref, w_qkv_ref, wp_ref, w1_ref, w2_ref, vec_ref, o_ref):
    x = x_ref[...]                                              # (B*N, D)
    vec = vec_ref[...]                                          # (8, 128) packed

    ln1_g = vec[ROW_LN1_G:ROW_LN1_G + 1, :D]
    ln1_b = vec[ROW_LN1_B:ROW_LN1_B + 1, :D]
    bp    = vec[ROW_BP:ROW_BP + 1, :D]
    ln2_g = vec[ROW_LN2_G:ROW_LN2_G + 1, :D]
    ln2_b = vec[ROW_LN2_B:ROW_LN2_B + 1, :D]
    b2    = vec[ROW_B2:ROW_B2 + 1, :D]
    b1    = vec[ROW_B1:ROW_B1 + 1, :HIDDEN]

    # ---------------- attention branch: attn(ln1(x)) -------------------------
    xn = _layer_norm(x, ln1_g, ln1_b)                           # (B*N, D)

    # Fused QKV: single (16,32)@(32,192) MXU push.
    qkv = jnp.dot(xn, w_qkv_ref[...],
                  preferred_element_type=jnp.float32)           # (BN, 3*INNER)
    q = qkv[:, 0 * INNER:1 * INNER]                             # (BN, 64)
    k = qkv[:, 1 * INNER:2 * INNER]
    v = qkv[:, 2 * INNER:3 * INNER]

    # Per-head attention (static 4-iter loop); heads sliced from the fused
    # result, outputs concatenated for ONE projection matmul at the end.
    head_outs = []
    for h in range(HEADS):
        lo, hi = h * DIM_HEAD, (h + 1) * DIM_HEAD
        qh = q[:, lo:hi].reshape(B, N, DIM_HEAD)                # leading-dim split
        kh = k[:, lo:hi].reshape(B, N, DIM_HEAD)
        vh = v[:, lo:hi].reshape(B, N, DIM_HEAD)

        sim = jnp.einsum('bnd,bmd->bnm', qh, kh,
                         preferred_element_type=jnp.float32) * SCALE   # (B,N,N)
        sim = sim - jnp.max(sim, axis=-1, keepdims=True)
        p = jnp.exp(sim)
        p = p / jnp.sum(p, axis=-1, keepdims=True)              # exact softmax
        oh = jnp.einsum('bnm,bmd->bnd', p, vh,
                        preferred_element_type=jnp.float32)     # (B,N,dh)
        head_outs.append(oh.reshape(BN, DIM_HEAD))              # (BN, dh)

    heads_cat = jnp.concatenate(head_outs, axis=-1)             # (BN, INNER)
    attn_proj = jnp.dot(heads_cat, wp_ref[...],
                        preferred_element_type=jnp.float32)     # single (16,64)@(64,32)

    x1 = x + attn_proj + bp                                     # residual 1

    # ---------------- MLP branch: mlp(ln2(x1)) --------------------------------
    xn2 = _layer_norm(x1, ln2_g, ln2_b)                         # (B*N, D)
    h1 = jnp.dot(xn2, w1_ref[...],
                 preferred_element_type=jnp.float32) + b1       # (BN, HIDDEN)
    # exact GELU (torch nn.GELU default): 0.5 * x * (1 + erf(x / sqrt(2)))
    h1 = 0.5 * h1 * (1.0 + jax.lax.erf(h1 * INV_SQRT2))
    h2 = jnp.dot(h1, w2_ref[...],
                 preferred_element_type=jnp.float32) + b2       # (BN, D)

    o_ref[...] = x1 + h2                                        # residual 2


@jax.jit
def transformer_block(x, params):
    """x: (B, N, D) float32.  params: dict of weights (see init_params)."""
    # Fused, lane-dense weights built OUTSIDE the kernel (tiny, one-time cost).
    w_qkv = jnp.concatenate([params["wq"], params["wk"], params["wv"]],
                            axis=1)                              # (D, 3*INNER) = (32, 192)

    # Pack all small bias / LN vectors into one (8, 128) operand.
    vec = jnp.zeros((8, 128), jnp.float32)
    vec = vec.at[ROW_LN1_G, :D].set(params["ln1_g"][0])
    vec = vec.at[ROW_LN1_B, :D].set(params["ln1_b"][0])
    vec = vec.at[ROW_BP,    :D].set(params["bp"][0])
    vec = vec.at[ROW_LN2_G, :D].set(params["ln2_g"][0])
    vec = vec.at[ROW_LN2_B, :D].set(params["ln2_b"][0])
    vec = vec.at[ROW_B2,    :D].set(params["b2"][0])
    vec = vec.at[ROW_B1,    :HIDDEN].set(params["b1"][0])

    x2d = x.reshape(BN, D)   # fold batch into rows (contiguous -> free)

    out2d = pl.pallas_call(
        block_kernel,
        out_shape=jax.ShapeDtypeStruct((BN, D), jnp.float32),
        # Single invocation, no grid: all operands (~100 KiB incl. padding) fit
        # comfortably in VMEM on every generation; nothing to pipeline.
    )(x2d, w_qkv, params["wp"], params["w1"], params["w2"], vec)

    return out2d.reshape(B, N, D)


def init_params(key):
    ks = jax.random.split(key, 8)
    n = lambda k, shape, s=0.02: (jax.random.normal(k, shape, jnp.float32) * s)
    return {
        "ln1_g": jnp.ones((1, D), jnp.float32),
        "ln1_b": jnp.zeros((1, D), jnp.float32),
        "wq": n(ks[0], (D, INNER)),
        "wk": n(ks[1], (D, INNER)),
        "wv": n(ks[2], (D, INNER)),
        "wp": n(ks[3], (INNER, D)),
        "bp": n(ks[4], (1, D)),
        "ln2_g": jnp.ones((1, D), jnp.float32),
        "ln2_b": jnp.zeros((1, D), jnp.float32),
        "w1": n(ks[5], (D, HIDDEN)),
        "b1": jnp.zeros((1, HIDDEN), jnp.float32),
        "w2": n(ks[6], (HIDDEN, D)),
        "b2": jnp.zeros((1, D), jnp.float32),
    }


def reference_block(x, p):
    """Pure-JAX reference implementing the same math as the PyTorch module."""
    def ln(t, g, b):
        mu = jnp.mean(t, -1, keepdims=True)
        var = jnp.mean((t - mu) ** 2, -1, keepdims=True)
        return (t - mu) / jnp.sqrt(var + LN_EPS) * g + b

    xn = ln(x, p["ln1_g"][0], p["ln1_b"][0])
    q = xn @ p["wq"]; k = xn @ p["wk"]; v = xn @ p["wv"]
    def split(t):  # (B,N,H*dh) -> (B,H,N,dh)
        return t.reshape(B, N, HEADS, DIM_HEAD).transpose(0, 2, 1, 3)
    qh, kh, vh = split(q), split(k), split(v)
    sim = jnp.einsum("bhid,bhjd->bhij", qh, kh) * SCALE
    attn = jax.nn.softmax(sim, axis=-1)
    out = jnp.einsum("bhij,bhjd->bhid", attn, vh)
    out = out.transpose(0, 2, 1, 3).reshape(B, N, INNER)
    x1 = x + out @ p["wp"] + p["bp"][0]
    xn2 = ln(x1, p["ln2_g"][0], p["ln2_b"][0])
    h1 = xn2 @ p["w1"] + p["b1"][0]
    h1 = 0.5 * h1 * (1.0 + jax.lax.erf(h1 / jnp.sqrt(2.0)))
    return x1 + h1 @ p["w2"] + p["b2"][0]


if __name__ == "__main__":
    key = jax.random.PRNGKey(0)
    kx, kp = jax.random.split(key)
    x = jax.random.normal(kx, (B, N, D), jnp.float32)
    params = init_params(kp)

    out = transformer_block(x, params)
    out = jax.block_until_ready(out)

    ref = reference_block(x, params)
    assert out.shape == (B, N, D)
    assert jnp.allclose(out, ref, atol=1e-3, rtol=1e-3), \
        f"max abs err {jnp.max(jnp.abs(out - ref))}"

    print("KERNEL_OK")
</pallas_src>

<mosaic_0001>
module attributes {stable_mosaic.version = 11 : i64} {
  func.func @block_kernel(%arg0: memref<16x32xf32, #tpu.memory_space<vmem>>, %arg1: memref<32x192xf32, #tpu.memory_space<vmem>>, %arg2: memref<64x32xf32, #tpu.memory_space<vmem>>, %arg3: memref<32x128xf32, #tpu.memory_space<vmem>>, %arg4: memref<128x32xf32, #tpu.memory_space<vmem>>, %arg5: memref<8x128xf32, #tpu.memory_space<vmem>>, %arg6: memref<16x32xf32, #tpu.memory_space<vmem>>) attributes {dimension_semantics = [], scalar_prefetch = 0 : i64, scratch_operands = 0 : i64, tpu.core_type = #tpu.core_type<tc>} {
    %c0 = arith.constant 0 : index
    %c0_0 = arith.constant 0 : index
    %0 = vector.load %arg0[%c0, %c0_0] : memref<16x32xf32, #tpu.memory_space<vmem>>, vector<16x32xf32>
    %c0_1 = arith.constant 0 : index
    %c0_2 = arith.constant 0 : index
    %1 = vector.load %arg5[%c0_1, %c0_2] : memref<8x128xf32, #tpu.memory_space<vmem>>, vector<8x128xf32>
    %2 = vector.extract_strided_slice %1 {offsets = [0, 0], sizes = [1, 32], strides = [1, 1]} : vector<8x128xf32> to vector<1x32xf32>
    %3 = vector.extract_strided_slice %1 {offsets = [1, 0], sizes = [1, 32], strides = [1, 1]} : vector<8x128xf32> to vector<1x32xf32>
    %4 = vector.extract_strided_slice %1 {offsets = [2, 0], sizes = [1, 32], strides = [1, 1]} : vector<8x128xf32> to vector<1x32xf32>
    %5 = vector.extract_strided_slice %1 {offsets = [3, 0], sizes = [1, 32], strides = [1, 1]} : vector<8x128xf32> to vector<1x32xf32>
    %6 = vector.extract_strided_slice %1 {offsets = [4, 0], sizes = [1, 32], strides = [1, 1]} : vector<8x128xf32> to vector<1x32xf32>
    %7 = vector.extract_strided_slice %1 {offsets = [5, 0], sizes = [1, 32], strides = [1, 1]} : vector<8x128xf32> to vector<1x32xf32>
    %8 = vector.extract_strided_slice %1 {offsets = [6, 0], sizes = [1, 128], strides = [1, 1]} : vector<8x128xf32> to vector<1x128xf32>
    %cst = arith.constant dense<0.000000e+00> : vector<16xf32>
    %9 = vector.multi_reduction <add>, %0, %cst [1] : vector<16x32xf32> to vector<16xf32>
    %10 = vector.shape_cast %9 : vector<16xf32> to vector<16x1xf32>
    %cst_3 = arith.constant 3.200000e+01 : f32
    %11 = vector.broadcast %cst_3 : f32 to vector<16x1xf32>
    %12 = arith.divf %10, %11 : vector<16x1xf32>
    %13 = vector.broadcast %12 : vector<16x1xf32> to vector<16x32xf32>
    %14 = arith.subf %0, %13 : vector<16x32xf32>
    %15 = arith.mulf %14, %14 : vector<16x32xf32>
    %cst_4 = arith.constant dense<0.000000e+00> : vector<16xf32>
    %16 = vector.multi_reduction <add>, %15, %cst_4 [1] : vector<16x32xf32> to vector<16xf32>
    %17 = vector.shape_cast %16 : vector<16xf32> to vector<16x1xf32>
    %cst_5 = arith.constant 3.200000e+01 : f32
    %18 = vector.broadcast %cst_5 : f32 to vector<16x1xf32>
    %19 = arith.divf %17, %18 : vector<16x1xf32>
    %20 = vector.broadcast %12 : vector<16x1xf32> to vector<16x32xf32>
    %21 = arith.subf %0, %20 : vector<16x32xf32>
    %cst_6 = arith.constant 9.99999974E-6 : f32
    %22 = vector.broadcast %cst_6 : f32 to vector<16x1xf32>
    %23 = arith.addf %19, %22 : vector<16x1xf32>
    %24 = math.rsqrt %23 : vector<16x1xf32>
    %25 = vector.broadcast %24 : vector<16x1xf32> to vector<16x32xf32>
    %26 = arith.mulf %21, %25 : vector<16x32xf32>
    %27 = vector.broadcast %2 : vector<1x32xf32> to vector<16x32xf32>
    %28 = arith.mulf %26, %27 : vector<16x32xf32>
    %29 = vector.broadcast %3 : vector<1x32xf32> to vector<16x32xf32>
    %30 = arith.addf %28, %29 : vector<16x32xf32>
    %c0_7 = arith.constant 0 : index
    %c0_8 = arith.constant 0 : index
    %31 = vector.load %arg1[%c0_7, %c0_8] : memref<32x192xf32, #tpu.memory_space<vmem>>, vector<32x192xf32>
    %cst_9 = arith.constant dense<0.000000e+00> : vector<16x192xf32>
    %32 = tpu.matmul %30, %31, %cst_9 {dimension_numbers = #tpu.dot_dimension_numbers<[1], [0], [0], [1], [0, 0, 1, 1], [], []>} : vector<16x32xf32>, vector<32x192xf32>, vector<16x192xf32> -> vector<16x192xf32>
    %33 = vector.extract_strided_slice %32 {offsets = [0, 0], sizes = [16, 64], strides = [1, 1]} : vector<16x192xf32> to vector<16x64xf32>
    %34 = vector.extract_strided_slice %32 {offsets = [0, 64], sizes = [16, 64], strides = [1, 1]} : vector<16x192xf32> to vector<16x64xf32>
    %35 = vector.extract_strided_slice %32 {offsets = [0, 128], sizes = [16, 64], strides = [1, 1]} : vector<16x192xf32> to vector<16x64xf32>
    %36 = vector.extract_strided_slice %33 {offsets = [0, 0], sizes = [16, 16], strides = [1, 1]} : vector<16x64xf32> to vector<16x16xf32>
    %37 = vector.shape_cast %36 : vector<16x16xf32> to vector<2x8x16xf32>
    %38 = vector.extract_strided_slice %34 {offsets = [0, 0], sizes = [16, 16], strides = [1, 1]} : vector<16x64xf32> to vector<16x16xf32>
    %39 = vector.shape_cast %38 : vector<16x16xf32> to vector<2x8x16xf32>
    %40 = vector.extract_strided_slice %35 {offsets = [0, 0], sizes = [16, 16], strides = [1, 1]} : vector<16x64xf32> to vector<16x16xf32>
    %41 = vector.shape_cast %40 : vector<16x16xf32> to vector<2x8x16xf32>
    "tpu.trace_start"() <{level = 10 : i32, message = "bnd,bmd->bnm"}> : () -> ()
    %cst_10 = arith.constant dense<0.000000e+00> : vector<2x8x8xf32>
    %42 = tpu.matmul %37, %39, %cst_10 {dimension_numbers = #tpu.dot_dimension_numbers<[2], [2], [1], [1], [0, 0, 0, 1, 1, 1], [0], [0]>} : vector<2x8x16xf32>, vector<2x8x16xf32>, vector<2x8x8xf32> -> vector<2x8x8xf32>
    "tpu.trace_stop"() : () -> ()
    %cst_11 = arith.constant 2.500000e-01 : f32
    %43 = vector.broadcast %cst_11 : f32 to vector<2x8x8xf32>
    %44 = arith.mulf %42, %43 : vector<2x8x8xf32>
    %cst_12 = arith.constant dense<0xFF800000> : vector<2x8xf32>
    %45 = vector.multi_reduction <maximumf>, %44, %cst_12 [2] : vector<2x8x8xf32> to vector<2x8xf32>
    %46 = vector.shape_cast %45 : vector<2x8xf32> to vector<2x8x1xf32>
    %47 = vector.broadcast %46 : vector<2x8x1xf32> to vector<2x8x8xf32>
    %48 = arith.subf %44, %47 : vector<2x8x8xf32>
    %49 = math.exp %48 : vector<2x8x8xf32>
    %cst_13 = arith.constant dense<0.000000e+00> : vector<2x8xf32>
    %50 = vector.multi_reduction <add>, %49, %cst_13 [2] : vector<2x8x8xf32> to vector<2x8xf32>
    %51 = vector.shape_cast %50 : vector<2x8xf32> to vector<2x8x1xf32>
    %52 = vector.broadcast %51 : vector<2x8x1xf32> to vector<2x8x8xf32>
    %53 = arith.divf %49, %52 : vector<2x8x8xf32>
    "tpu.trace_start"() <{level = 10 : i32, message = "bnm,bmd->bnd"}> : () -> ()
    %cst_14 = arith.constant dense<0.000000e+00> : vector<2x8x16xf32>
    %54 = tpu.matmul %53, %41, %cst_14 {dimension_numbers = #tpu.dot_dimension_numbers<[2], [1], [1], [2], [0, 0, 0, 1, 1, 2], [0], [0]>} : vector<2x8x8xf32>, vector<2x8x16xf32>, vector<2x8x16xf32> -> vector<2x8x16xf32>
    "tpu.trace_stop"() : () -> ()
    %55 = vector.shape_cast %54 : vector<2x8x16xf32> to vector<16x16xf32>
    %56 = vector.extract_strided_slice %33 {offsets = [0, 16], sizes = [16, 16], strides = [1, 1]} : vector<16x64xf32> to vector<16x16xf32>
    %57 = vector.shape_cast %56 : vector<16x16xf32> to vector<2x8x16xf32>
    %58 = vector.extract_strided_slice %34 {offsets = [0, 16], sizes = [16, 16], strides = [1, 1]} : vector<16x64xf32> to vector<16x16xf32>
    %59 = vector.shape_cast %58 : vector<16x16xf32> to vector<2x8x16xf32>
    %60 = vector.extract_strided_slice %35 {offsets = [0, 16], sizes = [16, 16], strides = [1, 1]} : vector<16x64xf32> to vector<16x16xf32>
    %61 = vector.shape_cast %60 : vector<16x16xf32> to vector<2x8x16xf32>
    "tpu.trace_start"() <{level = 10 : i32, message = "bnd,bmd->bnm"}> : () -> ()
    %cst_15 = arith.constant dense<0.000000e+00> : vector<2x8x8xf32>
    %62 = tpu.matmul %57, %59, %cst_15 {dimension_numbers = #tpu.dot_dimension_numbers<[2], [2], [1], [1], [0, 0, 0, 1, 1, 1], [0], [0]>} : vector<2x8x16xf32>, vector<2x8x16xf32>, vector<2x8x8xf32> -> vector<2x8x8xf32>
    "tpu.trace_stop"() : () -> ()
    %cst_16 = arith.constant 2.500000e-01 : f32
    %63 = vector.broadcast %cst_16 : f32 to vector<2x8x8xf32>
    %64 = arith.mulf %62, %63 : vector<2x8x8xf32>
    %cst_17 = arith.constant dense<0xFF800000> : vector<2x8xf32>
    %65 = vector.multi_reduction <maximumf>, %64, %cst_17 [2] : vector<2x8x8xf32> to vector<2x8xf32>
    %66 = vector.shape_cast %65 : vector<2x8xf32> to vector<2x8x1xf32>
    %67 = vector.broadcast %66 : vector<2x8x1xf32> to vector<2x8x8xf32>
    %68 = arith.subf %64, %67 : vector<2x8x8xf32>
    %69 = math.exp %68 : vector<2x8x8xf32>
    %cst_18 = arith.constant dense<0.000000e+00> : vector<2x8xf32>
    %70 = vector.multi_reduction <add>, %69, %cst_18 [2] : vector<2x8x8xf32> to vector<2x8xf32>
    %71 = vector.shape_cast %70 : vector<2x8xf32> to vector<2x8x1xf32>
    %72 = vector.broadcast %71 : vector<2x8x1xf32> to vector<2x8x8xf32>
    %73 = arith.divf %69, %72 : vector<2x8x8xf32>
    "tpu.trace_start"() <{level = 10 : i32, message = "bnm,bmd->bnd"}> : () -> ()
    %cst_19 = arith.constant dense<0.000000e+00> : vector<2x8x16xf32>
    %74 = tpu.matmul %73, %61, %cst_19 {dimension_numbers = #tpu.dot_dimension_numbers<[2], [1], [1], [2], [0, 0, 0, 1, 1, 2], [0], [0]>} : vector<2x8x8xf32>, vector<2x8x16xf32>, vector<2x8x16xf32> -> vector<2x8x16xf32>
    "tpu.trace_stop"() : () -> ()
    %75 = vector.shape_cast %74 : vector<2x8x16xf32> to vector<16x16xf32>
    %76 = vector.extract_strided_slice %33 {offsets = [0, 32], sizes = [16, 16], strides = [1, 1]} : vector<16x64xf32> to vector<16x16xf32>
    %77 = vector.shape_cast %76 : vector<16x16xf32> to vector<2x8x16xf32>
    %78 = vector.extract_strided_slice %34 {offsets = [0, 32], sizes = [16, 16], strides = [1, 1]} : vector<16x64xf32> to vector<16x16xf32>
    %79 = vector.shape_cast %78 : vector<16x16xf32> to vector<2x8x16xf32>
    %80 = vector.extract_strided_slice %35 {offsets = [0, 32], sizes = [16, 16], strides = [1, 1]} : vector<16x64xf32> to vector<16x16xf32>
    %81 = vector.shape_cast %80 : vector<16x16xf32> to vector<2x8x16xf32>
    "tpu.trace_start"() <{level = 10 : i32, message = "bnd,bmd->bnm"}> : () -> ()
    %cst_20 = arith.constant dense<0.000000e+00> : vector<2x8x8xf32>
    %82 = tpu.matmul %77, %79, %cst_20 {dimension_numbers = #tpu.dot_dimension_numbers<[2], [2], [1], [1], [0, 0, 0, 1, 1, 1], [0], [0]>} : vector<2x8x16xf32>, vector<2x8x16xf32>, vector<2x8x8xf32> -> vector<2x8x8xf32>
    "tpu.trace_stop"() : () -> ()
    %cst_21 = arith.constant 2.500000e-01 : f32
    %83 = vector.broadcast %cst_21 : f32 to vector<2x8x8xf32>
    %84 = arith.mulf %82, %83 : vector<2x8x8xf32>
    %cst_22 = arith.constant dense<0xFF800000> : vector<2x8xf32>
    %85 = vector.multi_reduction <maximumf>, %84, %cst_22 [2] : vector<2x8x8xf32> to vector<2x8xf32>
    %86 = vector.shape_cast %85 : vector<2x8xf32> to vector<2x8x1xf32>
    %87 = vector.broadcast %86 : vector<2x8x1xf32> to vector<2x8x8xf32>
    %88 = arith.subf %84, %87 : vector<2x8x8xf32>
    %89 = math.exp %88 : vector<2x8x8xf32>
    %cst_23 = arith.constant dense<0.000000e+00> : vector<2x8xf32>
    %90 = vector.multi_reduction <add>, %89, %cst_23 [2] : vector<2x8x8xf32> to vector<2x8xf32>
    %91 = vector.shape_cast %90 : vector<2x8xf32> to vector<2x8x1xf32>
    %92 = vector.broadcast %91 : vector<2x8x1xf32> to vector<2x8x8xf32>
    %93 = arith.divf %89, %92 : vector<2x8x8xf32>
    "tpu.trace_start"() <{level = 10 : i32, message = "bnm,bmd->bnd"}> : () -> ()
    %cst_24 = arith.constant dense<0.000000e+00> : vector<2x8x16xf32>
    %94 = tpu.matmul %93, %81, %cst_24 {dimension_numbers = #tpu.dot_dimension_numbers<[2], [1], [1], [2], [0, 0, 0, 1, 1, 2], [0], [0]>} : vector<2x8x8xf32>, vector<2x8x16xf32>, vector<2x8x16xf32> -> vector<2x8x16xf32>
    "tpu.trace_stop"() : () -> ()
    %95 = vector.shape_cast %94 : vector<2x8x16xf32> to vector<16x16xf32>
    %96 = vector.extract_strided_slice %33 {offsets = [0, 48], sizes = [16, 16], strides = [1, 1]} : vector<16x64xf32> to vector<16x16xf32>
    %97 = vector.shape_cast %96 : vector<16x16xf32> to vector<2x8x16xf32>
    %98 = vector.extract_strided_slice %34 {offsets = [0, 48], sizes = [16, 16], strides = [1, 1]} : vector<16x64xf32> to vector<16x16xf32>
    %99 = vector.shape_cast %98 : vector<16x16xf32> to vector<2x8x16xf32>
    %100 = vector.extract_strided_slice %35 {offsets = [0, 48], sizes = [16, 16], strides = [1, 1]} : vector<16x64xf32> to vector<16x16xf32>
    %101 = vector.shape_cast %100 : vector<16x16xf32> to vector<2x8x16xf32>
    "tpu.trace_start"() <{level = 10 : i32, message = "bnd,bmd->bnm"}> : () -> ()
    %cst_25 = arith.constant dense<0.000000e+00> : vector<2x8x8xf32>
    %102 = tpu.matmul %97, %99, %cst_25 {dimension_numbers = #tpu.dot_dimension_numbers<[2], [2], [1], [1], [0, 0, 0, 1, 1, 1], [0], [0]>} : vector<2x8x16xf32>, vector<2x8x16xf32>, vector<2x8x8xf32> -> vector<2x8x8xf32>
    "tpu.trace_stop"() : () -> ()
    %cst_26 = arith.constant 2.500000e-01 : f32
    %103 = vector.broadcast %cst_26 : f32 to vector<2x8x8xf32>
    %104 = arith.mulf %102, %103 : vector<2x8x8xf32>
    %cst_27 = arith.constant dense<0xFF800000> : vector<2x8xf32>
    %105 = vector.multi_reduction <maximumf>, %104, %cst_27 [2] : vector<2x8x8xf32> to vector<2x8xf32>
    %106 = vector.shape_cast %105 : vector<2x8xf32> to vector<2x8x1xf32>
    %107 = vector.broadcast %106 : vector<2x8x1xf32> to vector<2x8x8xf32>
    %108 = arith.subf %104, %107 : vector<2x8x8xf32>
    %109 = math.exp %108 : vector<2x8x8xf32>
    %cst_28 = arith.constant dense<0.000000e+00> : vector<2x8xf32>
    %110 = vector.multi_reduction <add>, %109, %cst_28 [2] : vector<2x8x8xf32> to vector<2x8xf32>
    %111 = vector.shape_cast %110 : vector<2x8xf32> to vector<2x8x1xf32>
    %112 = vector.broadcast %111 : vector<2x8x1xf32> to vector<2x8x8xf32>
    %113 = arith.divf %109, %112 : vector<2x8x8xf32>
    "tpu.trace_start"() <{level = 10 : i32, message = "bnm,bmd->bnd"}> : () -> ()
    %cst_29 = arith.constant dense<0.000000e+00> : vector<2x8x16xf32>
    %114 = tpu.matmul %113, %101, %cst_29 {dimension_numbers = #tpu.dot_dimension_numbers<[2], [1], [1], [2], [0, 0, 0, 1, 1, 2], [0], [0]>} : vector<2x8x8xf32>, vector<2x8x16xf32>, vector<2x8x16xf32> -> vector<2x8x16xf32>
    "tpu.trace_stop"() : () -> ()
    %115 = vector.shape_cast %114 : vector<2x8x16xf32> to vector<16x16xf32>
    %116 = tpu.concatenate %55, %75, %95, %115 in 1 : vector<16x16xf32>, vector<16x16xf32>, vector<16x16xf32>, vector<16x16xf32> -> vector<16x64xf32>
    %c0_30 = arith.constant 0 : index
    %c0_31 = arith.constant 0 : index
    %117 = vector.load %arg2[%c0_30, %c0_31] : memref<64x32xf32, #tpu.memory_space<vmem>>, vector<64x32xf32>
    %cst_32 = arith.constant dense<0.000000e+00> : vector<16x32xf32>
    %118 = tpu.matmul %116, %117, %cst_32 {dimension_numbers = #tpu.dot_dimension_numbers<[1], [0], [0], [1], [0, 0, 1, 1], [], []>} : vector<16x64xf32>, vector<64x32xf32>, vector<16x32xf32> -> vector<16x32xf32>
    %119 = arith.addf %0, %118 : vector<16x32xf32>
    %120 = vector.broadcast %4 : vector<1x32xf32> to vector<16x32xf32>
    %121 = arith.addf %119, %120 : vector<16x32xf32>
    %cst_33 = arith.constant dense<0.000000e+00> : vector<16xf32>
    %122 = vector.multi_reduction <add>, %121, %cst_33 [1] : vector<16x32xf32> to vector<16xf32>
    %123 = vector.shape_cast %122 : vector<16xf32> to vector<16x1xf32>
    %cst_34 = arith.constant 3.200000e+01 : f32
    %124 = vector.broadcast %cst_34 : f32 to vector<16x1xf32>
    %125 = arith.divf %123, %124 : vector<16x1xf32>
    %126 = vector.broadcast %125 : vector<16x1xf32> to vector<16x32xf32>
    %127 = arith.subf %121, %126 : vector<16x32xf32>
    %128 = arith.mulf %127, %127 : vector<16x32xf32>
    %cst_35 = arith.constant dense<0.000000e+00> : vector<16xf32>
    %129 = vector.multi_reduction <add>, %128, %cst_35 [1] : vector<16x32xf32> to vector<16xf32>
    %130 = vector.shape_cast %129 : vector<16xf32> to vector<16x1xf32>
    %cst_36 = arith.constant 3.200000e+01 : f32
    %131 = vector.broadcast %cst_36 : f32 to vector<16x1xf32>
    %132 = arith.divf %130, %131 : vector<16x1xf32>
    %133 = vector.broadcast %125 : vector<16x1xf32> to vector<16x32xf32>
    %134 = arith.subf %121, %133 : vector<16x32xf32>
    %cst_37 = arith.constant 9.99999974E-6 : f32
    %135 = vector.broadcast %cst_37 : f32 to vector<16x1xf32>
    %136 = arith.addf %132, %135 : vector<16x1xf32>
    %137 = math.rsqrt %136 : vector<16x1xf32>
    %138 = vector.broadcast %137 : vector<16x1xf32> to vector<16x32xf32>
    %139 = arith.mulf %134, %138 : vector<16x32xf32>
    %140 = vector.broadcast %5 : vector<1x32xf32> to vector<16x32xf32>
    %141 = arith.mulf %139, %140 : vector<16x32xf32>
    %142 = vector.broadcast %6 : vector<1x32xf32> to vector<16x32xf32>
    %143 = arith.addf %141, %142 : vector<16x32xf32>
    %c0_38 = arith.constant 0 : index
    %c0_39 = arith.constant 0 : index
    %144 = vector.load %arg3[%c0_38, %c0_39] : memref<32x128xf32, #tpu.memory_space<vmem>>, vector<32x128xf32>
    %cst_40 = arith.constant dense<0.000000e+00> : vector<16x128xf32>
    %145 = tpu.matmul %143, %144, %cst_40 {dimension_numbers = #tpu.dot_dimension_numbers<[1], [0], [0], [1], [0, 0, 1, 1], [], []>} : vector<16x32xf32>, vector<32x128xf32>, vector<16x128xf32> -> vector<16x128xf32>
    %146 = vector.broadcast %8 : vector<1x128xf32> to vector<16x128xf32>
    %147 = arith.addf %145, %146 : vector<16x128xf32>
    %cst_41 = arith.constant 5.000000e-01 : f32
    %148 = vector.broadcast %cst_41 : f32 to vector<16x128xf32>
    %149 = arith.mulf %148, %147 : vector<16x128xf32>
    %cst_42 = arith.constant 0.707106769 : f32
    %150 = vector.broadcast %cst_42 : f32 to vector<16x128xf32>
    %151 = arith.mulf %147, %150 : vector<16x128xf32>
    %152 = math.erf %151 : vector<16x128xf32>
    %cst_43 = arith.constant 1.000000e+00 : f32
    %153 = vector.broadcast %cst_43 : f32 to vector<16x128xf32>
    %154 = arith.addf %153, %152 : vector<16x128xf32>
    %155 = arith.mulf %149, %154 : vector<16x128xf32>
    %c0_44 = arith.constant 0 : index
    %c0_45 = arith.constant 0 : index
    %156 = vector.load %arg4[%c0_44, %c0_45] : memref<128x32xf32, #tpu.memory_space<vmem>>, vector<128x32xf32>
    %cst_46 = arith.constant dense<0.000000e+00> : vector<16x32xf32>
    %157 = tpu.matmul %155, %156, %cst_46 {dimension_numbers = #tpu.dot_dimension_numbers<[1], [0], [0], [1], [0, 0, 1, 1], [], []>} : vector<16x128xf32>, vector<128x32xf32>, vector<16x32xf32> -> vector<16x32xf32>
    %158 = vector.broadcast %7 : vector<1x32xf32> to vector<16x32xf32>
    %159 = arith.addf %157, %158 : vector<16x32xf32>
    %160 = arith.addf %121, %159 : vector<16x32xf32>
    %c0_47 = arith.constant 0 : index
    %c0_48 = arith.constant 0 : index
    %161 = vector.load %arg6[%c0_47, %c0_48] : memref<16x32xf32, #tpu.memory_space<vmem>>, vector<16x32xf32>
    tpu.vector_store %arg6[%c0_47, %c0_48], %160 {strides = array<i32>} : memref<16x32xf32, #tpu.memory_space<vmem>>, vector<16x32xf32>,
    return
  }
}

</mosaic_0001>

<bundles_post_ra>
// kernel: transformer_block.1
= control target key start
LH: loop header
LB: loop body
LE: loop exit
PB: predicated region body
PF: predicated region fallthrough
CT: control target
= control target key end

     0   :  { %vm27_vm0 = vcmask 261120   ;;  %s2563_s0 = inlined_call_operand.vmem [shape: f32[16,32], index: 0, kind: input, shape index: {}]   ;;  %s2564_s1 = inlined_call_operand.vmem [shape: f32[32,192], index: 1, kind: input, shape index: {}]   ;;  %s2565_s2 = inlined_call_operand.vmem [shape: f32[64,32], index: 2, kind: input, shape index: {}]   ;;  %s2566_s3 = inlined_call_operand.vmem [shape: f32[32,128], index: 3, kind: input, shape index: {}]   ;;  %s2567_s4 = inlined_call_operand.vmem [shape: f32[128,32], index: 4, kind: input, shape index: {}]   ;;  %s2568_s5 = inlined_call_operand.vmem [shape: f32[8,128], index: 5, kind: input, shape index: {}]   ;;  %s2569_s6 = inlined_call_operand.hbm [shape: f32[16,32], index: 6, kind: output, shape index: {}]  }
   0x1   :  { %v2232_v0 = vld [vmem:[%s2563_s0] sm:$0xff]  ;;  %v2237_v1 = vld [vmem:[%s2563_s0 + $0x8] sm:$0xff] }
   0x2   :  { %11 = vsyncpa [#allocation3], 0  ;;  %v28_v2 = vsel %vm27_vm0, %v2232_v0, 0.0  ;;  %v31_v3 = vsel %vm27_vm0, %v2237_v1, 0.0  ;;  %v74_v14 = vld [vmem:[%s2564_s1 + $0x38] sm:$0xff]  ;;  %v73_v15 = vld [vmem:[%s2564_s1 + $0x30] sm:$0xff]  ;;  %v55_v28 = vlaneseq }
   0x3   :  { %29 = vadd.xlane.f32.xlu0 %v28_v2  ;;  %v72_v16 = vld [vmem:[%s2564_s1 + $0x28] sm:$0xff]  ;;  %105 = vmatprep.subr.mxu1 %v74_v14  ;;  %v71_v17 = vld [vmem:[%s2564_s1 + $0x20] sm:$0xff]  ;;  %v2182_v18 = vmov 0.0   ;;  %v70_v19 = vld [vmem:[%s2564_s1 + $0x18] sm:$0xff]  ;;  %vm2183_vm1 = vmmov 0   ;;  %vm161_vm2 = vcmask 130048  }
   0x4   :  { %145 = vmatprep.mubr.f32.mxu1 %v2182_v18  ;;  %106 = vmatpush1.msra.mxu1 %v73_v15  ;;  %v69_v20 = vld [vmem:[%s2564_s1 + $0x10] sm:$0xff]  ;;  %v68_v21 = vld [vmem:[%s2564_s1 + $0x8] sm:$0xff]  ;;  %v67_v22 = vld [vmem:[%s2564_s1] sm:$0xff]  ;;  %v2274_v30 = vshrl.u32 %v55_v28, 7  ;;  %vm315_vm3 = vcmask 64512   ;;  %s2185_s17 = smov 48  }
   0x5   :  { %1974 = vmatprep.subr.mxu0 %v2182_v18  ;;  %107 = vmatprep.subr.mxu1 %v72_v16  ;;  %v2280_v32 = vld [vmem:[%s2568_s5] sm:$0xff]  ;;  %s2184_s5 = smov 64   ;;  %s2186_s18 = smov 112   ;;  %vm1510_vm4 = vcmask 392192   ;;  %vm1521_vm5 = vcmask 523264  }
   0x6   :  { %108 = vmatpush1.msra.mxu1 %v71_v17  ;;  %v57_v31 = vsub.s32 0, %v2274_v30  ;;  %v63_v33 = vsub.s32 1, %v2274_v30  ;;  %1976 = vmatprep.mubr.msk.f32.mxu0 %vm2183_vm1, %v2182_v18  ;;  %s2187_s19 = smov 32   ;;  %s2188_s20 = smov 96  }
   0x7   :  { %32 = vadd.xlane.f32.xlu0 %v31_v3  ;;  %109 = vmatprep.subr.mxu1 %v70_v19  ;;  %s2189_s21 = smov 16   ;;  %s2190_s22 = smov 80  }
   0x8   :  { %110 = vmatpush1.msra.mxu1 %v69_v20  ;;  %v58_v34 = vrot.slane %v2280_v32, %v57_v31  ;;  %v64_v37 = vrot.slane %v2280_v32, %v63_v33 }
   0x9   :  { %111 = vmatprep.subr.mxu1 %v68_v21 }
   0xa   :  { %112 = vmatpush1.msra.mxu1 %v67_v22 }
   0xb   :  { %1959 = vmatprep.subr.mxu1 %v2182_v18 }
  0x8c   :  { %v30_v4 = vpop.xlane.xlu0 %29 }
  0x8d   :  { %v35_v5 = vmul.f32 0.03125, %v30_v4 }
  0x8f   :  { %v37_v6 = vsub.f32 %v2232_v0, %v35_v5 }
  0x90   :  { %v33_v7 = vpop.xlane.xlu0 %32 }
  0x91   :  { %v36_v8 = vmul.f32 0.03125, %v33_v7  ;;  %v39_v9 = vmul.f32 %v37_v6, %v37_v6 }
  0x93   :  { %v38_v10 = vsub.f32 %v2237_v1, %v36_v8  ;;  %v41_v11 = vsel %vm27_vm0, %v39_v9, 0.0 }
  0x94   :  { %42 = vadd.xlane.f32.xlu1 %v41_v11 }
  0x95   :  { %v40_v12 = vmul.f32 %v38_v10, %v38_v10 }
  0x97   :  { %v44_v13 = vsel %vm27_vm0, %v40_v12, 0.0 }
  0x98   :  { %45 = vadd.xlane.f32.xlu1 %v44_v13 }
 0x11d   :  { %v43_v23 = vpop.xlane.xlu1 %42 }
 0x11e   :  { %v47_v24 = vmul.f32 0.03125, %v43_v23 }
 0x120   :  { %v49_v25 = vadd.f32 1e-05, %v47_v24 }
 0x121   :  { %v46_v26 = vpop.xlane.xlu1 %45 }
 0x122   :  { %2116 = vrsqrt.f32 %v49_v25  ;;  %v48_v27 = vmul.f32 0.03125, %v46_v26 }
 0x124   :  { %v50_v29 = vadd.f32 1e-05, %v48_v27 }
 0x126   :  { %2118 = vrsqrt.f32 %v50_v29 }
 0x12f   :  { %v2117_v35 = vpop.eup %2116 }
 0x130   :  { %v53_v36 = vmul.f32 %v2117_v35, %v37_v6 }
 0x132   :  { %v59_v38 = vmul.f32 %v58_v34, %v53_v36 }
 0x133   :  { %v2119_v39 = vpop.eup %2118 }
 0x134   :  { %v65_v40 = vadd.f32 %v64_v37, %v59_v38  ;;  %v54_v41 = vmul.f32 %v2119_v39, %v38_v10 }
 0x136   :  { %1863 = vmatmul.mubr.msk.f32.vlgmr.msra.gmra.mxu1 %vm27_vm0, %v65_v40  ;;  %v60_v42 = vmul.f32 %v58_v34, %v54_v41 }
 0x137   :  { %151 = vmatprep.mubr.f32.mxu1 %v2182_v18 }
 0x138   :  { %v66_v43 = vadd.f32 %v64_v37, %v60_v42 }
 0x13a   :  { %1864 = vmatmul.mubr.msk.f32.gmra.mxu1 %vm27_vm0, %v66_v43 }
 0x13b   :  { %1961 = vmatprep.mubr.msk.f32.mxu1 %vm2183_vm1, %v2182_v18 }
 0x1f6   :  { %v2292_v44 = vpop.f32.mrf.mxu1 }
 0x1f7   :  { %159 = vrot.lane.b32.xlu0 %v2292_v44, %s2184_s5 }
 0x1f8   :  { %v2295_v45 = vpop.f32.mrf.mxu1 }
 0x1fa   :  { %v2297_v46 = vpop.f32.mrf.mxu1 }
 0x1fb   :  { %237 = vrot.lane.b32.xlu1 %v2297_v46, %s2184_s5 }
 0x1fc   :  { %v2300_v47 = vpop.f32.mrf.mxu1 }
 0x1fd   :  { %1975 = vmatpush3.msra.mxu0 %v2300_v47 }
 0x1fe   :  { %1984 = vmatprep.subr.mxu0 %v2182_v18 }
 0x269   :  { %v160_v48 = vpop.permute.xlu0 %159 }
 0x26a   :  { %1960 = vmatpush3.xpose.msk.msra.mxu1 %vm161_vm2, %v160_v48 }
 0x26b   :  { %1964 = vmatprep.subr.mxu1 %v2182_v18 }
 0x26d   :  { %v238_v49 = vpop.permute.xlu1 %237  ;;  %1962 = vmatmul.mubr.msk.f32.vlgmr.msra.gmra.mxu1 %vm161_vm2, %v2292_v44 }
 0x26e   :  { %1965 = vmatpush3.xpose.msk.msra.mxu1 %vm161_vm2, %v238_v49  ;;  %1966 = vmatprep.mubr.msk.f32.mxu1 %vm2183_vm1, %v2182_v18 }
 0x26f   :  { %1969 = vmatprep.subr.mxu1 %v2182_v18 }
 0x271   :  { %1967 = vmatmul.mubr.msk.f32.vlgmr.msra.gmra.mxu1 %vm161_vm2, %v2297_v46 }
 0x272   :  { %1970 = vmatpush3.msra.mxu1 %v2295_v45  ;;  %1971 = vmatprep.mubr.msk.f32.mxu1 %vm2183_vm1, %v2182_v18 }
 0x273   :  { %1979 = vmatprep.subr.mxu1 %v2182_v18 }
 0x32d   :  { %v232_v50 = vpop.f32.mrf.mxu1 }
 0x32e   :  { %v313_v51 = vmul.f32 0.25, %v232_v50 }
 0x32f   :  { %v1963_v52 = vpop.f32.mrf.mxu1 }
 0x330   :  { %v316_v53 = vsel %vm315_vm3, %v313_v51, -inf }
 0x331   :  { %317 = vmax.xlane.f32.xlu1 %v316_v53  ;;  %v309_v54 = vpop.f32.mrf.mxu1 }
 0x332   :  { %v314_v55 = vmul.f32 0.25, %v309_v54 }
 0x333   :  { %v1968_v56 = vpop.f32.mrf.mxu1 }
 0x334   :  { %v319_v57 = vsel %vm315_vm3, %v314_v55, -inf }
 0x335   :  { %320 = vmax.xlane.f32.xlu0 %v319_v57 }
 0x342   :  { %564 = vrot.lane.b32.xlu1 %v2297_v46, %s2185_s17 }
 0x346   :  { %484 = vrot.lane.b32.xlu1 %v2292_v44, %s2186_s18 }
 0x3ba   :  { %v318_v58 = vpop.xlane.xlu1 %317 }
 0x3bb   :  { %v322_v59 = vsub.f32 %v313_v51, %v318_v58 }
 0x3bd   :  { %v324_v60 = vmul.f32 1.442695, %v322_v59 }
 0x3be   :  { %v321_v61 = vpop.xlane.xlu0 %320  ;;  %v565_v6 = vpop.permute.xlu1 %564 }
 0x3bf   :  { %2120 = vpow2.f32 %v324_v60  ;;  %v323_v62 = vsub.f32 %v314_v55, %v321_v61 }
 0x3c1   :  { %v326_v63 = vmul.f32 1.442695, %v323_v62 }
 0x3c2   :  { %v485_v7 = vpop.permute.xlu1 %484 }
 0x3c3   :  { %2122 = vpow2.f32 %v326_v63 }
 0x3cc   :  { %v2121_v2 = vpop.eup %2120 }
 0x3cd   :  { %v328_v3 = vsel %vm315_vm3, %v2121_v2, 0.0 }
 0x3ce   :  { %329 = vadd.xlane.f32.xlu0 %v328_v3 }
 0x3d0   :  { %v2123_v4 = vpop.eup %2122 }
 0x3d1   :  { %v331_v5 = vsel %vm315_vm3, %v2123_v4, 0.0 }
 0x3d2   :  { %332 = vadd.xlane.f32.xlu1 %v331_v5 }
 0x3e3   :  { %562 = vrot.lane.b32.xlu1 %v2297_v46, %s2186_s18 }
 0x3e4   :  { %486 = vrot.lane.b32.xlu0 %v2292_v44, %s2185_s17 }
 0x457   :  { %v330_v8 = vpop.xlane.xlu0 %329 }
 0x458   :  { %2124 = vrcp.f32 %v330_v8 }
 0x45b   :  { %v333_v9 = vpop.xlane.xlu1 %332  ;;  %v487_v12 = vpop.permute.xlu0 %486 }
 0x45c   :  { %2126 = vrcp.f32 %v333_v9 }
 0x45f   :  { %v563_v15 = vpop.permute.xlu1 %562 }
 0x465   :  { %v2125_v10 = vpop.eup %2124 }
 0x466   :  { %v335_v11 = vmul.f32 %v2125_v10, %v2121_v2 }
 0x468   :  { %1972 = vmatmul.mubr.msk.f32.vlgmr.msra.gmra.mxu1 %vm315_vm3, %v335_v11 }
 0x469   :  { %v2127_v13 = vpop.eup %2126  ;;  %1980 = vmatpush3.xpose.msk.msra.mxu1 %vm161_vm2, %v487_v12  ;;  %1981 = vmatprep.mubr.msk.f32.mxu1 %vm2183_vm1, %v2182_v18 }
 0x46a   :  { %v337_v14 = vmul.f32 %v2127_v13, %v2123_v4  ;;  %1989 = vmatprep.subr.mxu1 %v2182_v18 }
 0x46c   :  { %1977 = vmatmul.mubr.msk.f32.vlgmr.msra.gmra.mxu0 %vm315_vm3, %v337_v14  ;;  %1982 = vmatmul.mubr.msk.f32.vlgmr.msra.gmra.mxu1 %vm161_vm2, %v485_v7 }
 0x46d   :  { %1985 = vmatpush3.xpose.msk.msra.mxu0 %vm161_vm2, %v565_v6  ;;  %1986 = vmatprep.mubr.msk.f32.mxu0 %vm2183_vm1, %v2182_v18 }
 0x46e   :  { %1994 = vmatprep.subr.mxu0 %v2182_v18  ;;  %1991 = vmatprep.mubr.msk.f32.mxu1 %vm2183_vm1, %v2182_v18 }
 0x470   :  { %1987 = vmatmul.mubr.msk.f32.vlgmr.msra.gmra.mxu0 %vm161_vm2, %v563_v15 }
 0x471   :  { %1996 = vmatprep.mubr.msk.f32.mxu0 %vm2183_vm1, %v2182_v18 }
 0x528   :  { %v2346_v16 = vpop.f32.mrf.mxu1 }
 0x52a   :  { %v1973_v17 = vpop.f32.mrf.mxu1 }
 0x52c   :  { %v2348_v19 = vpop.f32.mrf.mxu0  ;;  %v558_v20 = vpop.f32.mrf.mxu1 }
 0x52d   :  { %v640_v21 = vmul.f32 0.25, %v558_v20 }
 0x52e   :  { %v1978_v22 = vpop.f32.mrf.mxu0  ;;  %v1983_v23 = vpop.f32.mrf.mxu1 }
 0x52f   :  { %v642_v24 = vsel %vm315_vm3, %v640_v21, -inf }
 0x530   :  { %v636_v25 = vpop.f32.mrf.mxu0  ;;  %643 = vmax.xlane.f32.xlu0 %v642_v24 }
 0x531   :  { %v641_v26 = vmul.f32 0.25, %v636_v25 }
 0x532   :  { %v1988_v27 = vpop.f32.mrf.mxu0 }
 0x533   :  { %v645_v28 = vsel %vm315_vm3, %v641_v26, -inf }
 0x534   :  { %646 = vmax.xlane.f32.xlu1 %v645_v28 }
 0x545   :  { %742 = vrot.lane.b32.xlu1 %v2300_v47, %s2186_s18 }
 0x546   :  { %665 = vrot.lane.b32.xlu0 %v2295_v45, %s2186_s18 }
 0x549   :  { %820 = vrot.lane.b32.xlu1 %v2292_v44, %s2187_s19 }
 0x54d   :  { %898 = vrot.lane.b32.xlu1 %v2297_v46, %s2187_s19 }
 0x551   :  { %896 = vrot.lane.b32.xlu1 %v2297_v46, %s2188_s20 }
 0x5b9   :  { %v644_v29 = vpop.xlane.xlu0 %643 }
 0x5ba   :  { %v648_v31 = vsub.f32 %v640_v21, %v644_v29 }
 0x5bc   :  { %v650_v33 = vmul.f32 1.442695, %v648_v31 }
 0x5bd   :  { %v647_v34 = vpop.xlane.xlu1 %646  ;;  %v666_v35 = vpop.permute.xlu0 %665 }
 0x5be   :  { %2128 = vpow2.f32 %v650_v33  ;;  %v649_v36 = vsub.f32 %v641_v26, %v647_v34  ;;  %1990 = vmatpush3.msra.mxu1 %v666_v35 }
 0x5bf   :  { %1999 = vmatprep.subr.mxu1 %v2182_v18 }
 0x5c0   :  { %v652_v37 = vmul.f32 1.442695, %v649_v36 }
 0x5c1   :  { %v743_v38 = vpop.permute.xlu1 %742 }
 0x5c2   :  { %2130 = vpow2.f32 %v652_v37  ;;  %1995 = vmatpush3.msra.mxu0 %v743_v38 }
 0x5c3   :  { %2004 = vmatprep.subr.mxu0 %v2182_v18 }
 0x5c5   :  { %v821_v49 = vpop.permute.xlu1 %820 }
 0x5c9   :  { %v899_v53 = vpop.permute.xlu1 %898 }
 0x5cb   :  { %v2129_v39 = vpop.eup %2128 }
 0x5cc   :  { %v654_v40 = vsel %vm315_vm3, %v2129_v39, 0.0 }
 0x5cd   :  { %655 = vadd.xlane.f32.xlu0 %v654_v40  ;;  %v897_v56 = vpop.permute.xlu1 %896 }
 0x5cf   :  { %v2131_v41 = vpop.eup %2130 }
 0x5d0   :  { %v657_v42 = vsel %vm315_vm3, %v2131_v41, 0.0 }
 0x5d1   :  { %658 = vadd.xlane.f32.xlu0 %v657_v42 }
 0x5e7   :  { %818 = vrot.lane.b32.xlu0 %v2292_v44, %s2188_s20 }
 0x656   :  { %v656_v43 = vpop.xlane.xlu0 %655 }
 0x657   :  { %2132 = vrcp.f32 %v656_v43 }
 0x65a   :  { %v659_v48 = vpop.xlane.xlu0 %658 }
 0x65b   :  { %2134 = vrcp.f32 %v659_v48 }
 0x65e   :  { %v819_v55 = vpop.permute.xlu0 %818 }
 0x664   :  { %v2133_v50 = vpop.eup %2132 }
 0x665   :  { %v661_v51 = vmul.f32 %v2133_v50, %v2129_v39 }
 0x667   :  { %1992 = vmatmul.mubr.msk.f32.vlgmr.msra.gmra.mxu1 %vm315_vm3, %v661_v51 }
 0x668   :  { %v2135_v52 = vpop.eup %2134  ;;  %2000 = vmatpush3.xpose.msk.msra.mxu1 %vm161_vm2, %v821_v49  ;;  %2001 = vmatprep.mubr.msk.f32.mxu1 %vm2183_vm1, %v2182_v18 }
 0x669   :  { %v663_v54 = vmul.f32 %v2135_v52, %v2131_v41  ;;  %2009 = vmatprep.subr.mxu1 %v2182_v18 }
 0x66b   :  { %1997 = vmatmul.mubr.msk.f32.vlgmr.msra.gmra.mxu0 %vm315_vm3, %v663_v54  ;;  %2002 = vmatmul.mubr.msk.f32.vlgmr.msra.gmra.mxu1 %vm161_vm2, %v819_v55 }
 0x66c   :  { %2005 = vmatpush3.xpose.msk.msra.mxu0 %vm161_vm2, %v899_v53  ;;  %2006 = vmatprep.mubr.msk.f32.mxu0 %vm2183_vm1, %v2182_v18 }
 0x66d   :  { %2014 = vmatprep.subr.mxu0 %v2182_v18  ;;  %2011 = vmatprep.mubr.msk.f32.mxu1 %vm2183_vm1, %v2182_v18 }
 0x66f   :  { %2007 = vmatmul.mubr.msk.f32.vlgmr.msra.gmra.mxu0 %vm161_vm2, %v897_v56 }
 0x670   :  { %2016 = vmatprep.mubr.msk.f32.mxu0 %vm2183_vm1, %v2182_v18 }
 0x727   :  { %v2384_v57 = vpop.f32.mrf.mxu1 }
 0x729   :  { %v1993_v58 = vpop.f32.mrf.mxu1 }
 0x72b   :  { %v2386_v59 = vpop.f32.mrf.mxu0  ;;  %v892_v60 = vpop.f32.mrf.mxu1 }
 0x72c   :  { %v974_v61 = vmul.f32 0.25, %v892_v60 }
 0x72d   :  { %v1998_v62 = vpop.f32.mrf.mxu0  ;;  %v2003_v63 = vpop.f32.mrf.mxu1 }
 0x72e   :  { %v976_v2 = vsel %vm315_vm3, %v974_v61, -inf }
 0x72f   :  { %v970_v3 = vpop.f32.mrf.mxu0  ;;  %977 = vmax.xlane.f32.xlu0 %v976_v2  ;;  %v1519_v2 = vld [vmem:[%s2565_s2 + $0x30] sm:$0xff] }
 0x730   :  { %v975_v4 = vmul.f32 0.25, %v970_v3  ;;  %v1518_v3 = vld [vmem:[%s2565_s2 + $0x28] sm:$0xff] }
 0x731   :  { %v2008_v5 = vpop.f32.mrf.mxu0 }
 0x732   :  { %v979_v6 = vsel %vm315_vm3, %v975_v4, -inf  ;;  %v1516_v5 = vld [vmem:[%s2565_s2 + $0x18] sm:$0xff] }
 0x733   :  { %980 = vmax.xlane.f32.xlu1 %v979_v6  ;;  %v1515_v6 = vld [vmem:[%s2565_s2 + $0x10] sm:$0xff] }
 0x744   :  { %1074 = vrot.lane.b32.xlu1 %v2300_v47, %s2188_s20 }
 0x745   :  { %998 = vrot.lane.b32.xlu0 %v2295_v45, %s2188_s20 }
 0x748   :  { %1152 = vrot.lane.b32.xlu1 %v2292_v44, %s2189_s21 }
 0x74c   :  { %1230 = vrot.lane.b32.xlu1 %v2297_v46, %s2189_s21 }
 0x750   :  { %1228 = vrot.lane.b32.xlu1 %v2297_v46, %s2190_s22 }
 0x7b8   :  { %v978_v7 = vpop.xlane.xlu0 %977 }
 0x7b9   :  { %v982_v8 = vsub.f32 %v974_v61, %v978_v7  ;;  %v1514_v7 = vld [vmem:[%s2565_s2 + $0x8] sm:$0xff] }
 0x7bb   :  { %v984_v9 = vmul.f32 1.442695, %v982_v8  ;;  %v1513_v8 = vld [vmem:[%s2565_s2] sm:$0xff] }
 0x7bc   :  { %v981_v10 = vpop.xlane.xlu1 %980  ;;  %v999_v11 = vpop.permute.xlu0 %998 }
 0x7bd   :  { %2136 = vpow2.f32 %v984_v9  ;;  %v983_v12 = vsub.f32 %v975_v4, %v981_v10  ;;  %2010 = vmatpush3.msra.mxu1 %v999_v11  ;;  %v1517_v4 = vld [vmem:[%s2565_s2 + $0x20] sm:$0xff] }
 0x7be   :  { %2019 = vmatprep.subr.mxu1 %v2182_v18 }
 0x7bf   :  { %v986_v13 = vmul.f32 1.442695, %v983_v12 }
 0x7c0   :  { %v1075_v14 = vpop.permute.xlu1 %1074 }
 0x7c1   :  { %2138 = vpow2.f32 %v986_v13  ;;  %2015 = vmatpush3.msra.mxu0 %v1075_v14 }
 0x7c2   :  { %2024 = vmatprep.subr.mxu0 %v2182_v18 }
 0x7c4   :  { %v1153_v23 = vpop.permute.xlu1 %1152 }
 0x7c8   :  { %v1231_v27 = vpop.permute.xlu1 %1230 }
 0x7ca   :  { %v2137_v15 = vpop.eup %2136 }
 0x7cb   :  { %v988_v17 = vsel %vm315_vm3, %v2137_v15, 0.0 }
 0x7cc   :  { %989 = vadd.xlane.f32.xlu0 %v988_v17  ;;  %v1229_v29 = vpop.permute.xlu1 %1228 }
 0x7ce   :  { %v2139_v46 = vpop.eup %2138 }
 0x7cf   :  { %v991_v20 = vsel %vm315_vm3, %v2139_v46, 0.0 }
 0x7d0   :  { %992 = vadd.xlane.f32.xlu0 %v991_v20 }
 0x7e6   :  { %1150 = vrot.lane.b32.xlu0 %v2292_v44, %s2190_s22 }
 0x855   :  { %v990_v21 = vpop.xlane.xlu0 %989 }
 0x856   :  { %2140 = vrcp.f32 %v990_v21 }
 0x859   :  { %v993_v22 = vpop.xlane.xlu0 %992 }
 0x85a   :  { %2142 = vrcp.f32 %v993_v22 }
 0x85d   :  { %v1151_v44 = vpop.permute.xlu0 %1150 }
 0x863   :  { %v2141_v24 = vpop.eup %2140 }
 0x864   :  { %v995_v25 = vmul.f32 %v2141_v24, %v2137_v15 }
 0x866   :  { %2012 = vmatmul.mubr.msk.f32.vlgmr.msra.gmra.mxu1 %vm315_vm3, %v995_v25 }
 0x867   :  { %v2143_v26 = vpop.eup %2142  ;;  %2020 = vmatpush3.xpose.msk.msra.mxu1 %vm161_vm2, %v1153_v23  ;;  %2021 = vmatprep.mubr.msk.f32.mxu1 %vm2183_vm1, %v2182_v18 }
 0x868   :  { %v997_v28 = vmul.f32 %v2143_v26, %v2139_v46  ;;  %2029 = vmatprep.subr.mxu1 %v2182_v18 }
 0x86a   :  { %2017 = vmatmul.mubr.msk.f32.vlgmr.msra.gmra.mxu0 %vm315_vm3, %v997_v28  ;;  %2022 = vmatmul.mubr.msk.f32.vlgmr.msra.gmra.mxu1 %vm161_vm2, %v1151_v44 }
 0x86b   :  { %2025 = vmatpush3.xpose.msk.msra.mxu0 %vm161_vm2, %v1231_v27  ;;  %2026 = vmatprep.mubr.msk.f32.mxu0 %vm2183_vm1, %v2182_v18  ;;  %v1607_v27 = vsub.s32 2, %v2274_v30 }
 0x86c   :  { %2034 = vmatprep.subr.mxu0 %v2182_v18  ;;  %2031 = vmatprep.mubr.msk.f32.mxu1 %vm2183_vm1, %v2182_v18 }
 0x86d   :  { %v1608_v28 = vrot.slane %v2280_v32, %v1607_v27 }
 0x86e   :  { %2027 = vmatmul.mubr.msk.f32.vlgmr.msra.gmra.mxu0 %vm161_vm2, %v1229_v29 }
 0x86f   :  { %2036 = vmatprep.mubr.msk.f32.mxu0 %vm2183_vm1, %v2182_v18 }
 0x926   :  { %v1070_v31 = vpop.f32.mrf.mxu1 }
 0x928   :  { %v2013_v33 = vpop.f32.mrf.mxu1 }
 0x92a   :  { %v1146_v34 = vpop.f32.mrf.mxu0  ;;  %v1224_v35 = vpop.f32.mrf.mxu1 }
 0x92b   :  { %v1306_v36 = vmul.f32 0.25, %v1224_v35 }
 0x92c   :  { %v2018_v37 = vpop.f32.mrf.mxu0  ;;  %v2023_v38 = vpop.f32.mrf.mxu1 }
 0x92d   :  { %v1308_v39 = vsel %vm315_vm3, %v1306_v36, -inf }
 0x92e   :  { %v1302_v40 = vpop.f32.mrf.mxu0  ;;  %1309 = vmax.xlane.f32.xlu0 %v1308_v39 }
 0x92f   :  { %v1307_v41 = vmul.f32 0.25, %v1302_v40 }
 0x930   :  { %v2028_v42 = vpop.f32.mrf.mxu0 }
 0x931   :  { %v1311_v43 = vsel %vm315_vm3, %v1307_v41, -inf }
 0x932   :  { %1312 = vmax.xlane.f32.xlu1 %v1311_v43 }
 0x943   :  { %1406 = vrot.lane.b32.xlu1 %v2300_v47, %s2190_s22 }
 0x947   :  { %1484 = vrot.lane.b32.xlu1 %v2384_v57, %s2189_s21 }
 0x94b   :  { %1486 = vrot.lane.b32.xlu1 %v2386_v59, %s2189_s21 }
 0x94f   :  { %1494 = vrot.lane.b32.xlu1 %v1146_v34, %s2187_s19 }
 0x9b7   :  { %v1310_v18 = vpop.xlane.xlu0 %1309 }
 0x9b8   :  { %v1314_v48 = vsub.f32 %v1306_v36, %v1310_v18  ;;  %v1652_v18 = vld [vmem:[%s2566_s3 + $0x18] sm:$0xff] }
 0x9ba   :  { %v1316_v49 = vmul.f32 1.442695, %v1314_v48  ;;  %v1651_v48 = vld [vmem:[%s2566_s3 + $0x10] sm:$0xff] }
 0x9bb   :  { %v1313_v50 = vpop.xlane.xlu1 %1312 }
 0x9bc   :  { %2144 = vpow2.f32 %v1316_v49  ;;  %v1315_v51 = vsub.f32 %v1307_v41, %v1313_v50  ;;  %v1650_v49 = vld [vmem:[%s2566_s3 + $0x8] sm:$0xff]  ;;  %v1649_v50 = vld [vmem:[%s2566_s3] sm:$0xff] }
 0x9be   :  { %v1318_v52 = vmul.f32 1.442695, %v1315_v51  ;;  %v1763_v51 = vld [vmem:[%s2567_s4 + $0x78] sm:$0xff] }
 0x9bf   :  { %v1407_v53 = vpop.permute.xlu1 %1406 }
 0x9c0   :  { %2146 = vpow2.f32 %v1318_v52  ;;  %2035 = vmatpush3.msra.mxu0 %v1407_v53 }
 0x9c1   :  { %2058 = vmatprep.subr.mxu0 %v1652_v18 }
 0x9c3   :  { %v1485_v13 = vpop.permute.xlu1 %1484 }
 0x9c4   :  { %v1506_v17 = vsel %vm161_vm2, %v2346_v16, %v1485_v13  ;;  %v1755_v13 = vld [vmem:[%s2567_s4 + $0x38] sm:$0xff] }
 0x9c7   :  { %v1487_v14 = vpop.permute.xlu1 %1486 }
 0x9c8   :  { %v1507_v23 = vsel %vm161_vm2, %v2348_v19, %v1487_v14  ;;  %v1754_v14 = vld [vmem:[%s2567_s4 + $0x30] sm:$0xff] }
 0x9c9   :  { %v2145_v54 = vpop.eup %2144 }
 0x9ca   :  { %v1320_v47 = vsel %vm315_vm3, %v2145_v54, 0.0 }
 0x9cb   :  { %1321 = vadd.xlane.f32.xlu0 %v1320_v47  ;;  %v1495_v46 = vpop.permute.xlu1 %1494 }
 0x9cc   :  { %v1509_v24 = vsel %vm27_vm0, %v1507_v23, %v1495_v46  ;;  %v1751_v46 = vld [vmem:[%s2567_s4 + $0x18] sm:$0xff]  ;;  %v1655_v23 = vsub.s32 6, %v2274_v30 }
 0x9cd   :  { %v2147_v55 = vpop.eup %2146 }
 0x9ce   :  { %v1323_v56 = vsel %vm315_vm3, %v2147_v55, 0.0 }
 0x9cf   :  { %1324 = vadd.xlane.f32.xlu0 %v1323_v56 }
 0x9e5   :  { %1330 = vrot.lane.b32.xlu0 %v2295_v45, %s2190_s22  ;;  %v1520_v45 = vld [vmem:[%s2565_s2 + $0x38] sm:$0xff] }
 0x9e9   :  { %1492 = vrot.lane.b32.xlu0 %v1070_v31, %s2187_s19 }
 0xa54   :  { %v1322_v57 = vpop.xlane.xlu0 %1321 }
 0xa55   :  { %2148 = vrcp.f32 %v1322_v57  ;;  %v1639_v57 = vsub.s32 3, %v2274_v30 }
 0xa58   :  { %v1325_v58 = vpop.xlane.xlu0 %1324 }
 0xa59   :  { %2150 = vrcp.f32 %v1325_v58  ;;  %v1645_v58 = vsub.s32 4, %v2274_v30 }
 0xa5c   :  { %v1331_v59 = vpop.permute.xlu0 %1330 }
 0xa5d   :  { %2030 = vmatpush3.msra.mxu1 %v1331_v59  ;;  %v1640_v59 = vrot.slane %v2280_v32, %v1639_v57 }
 0xa5e   :  { %2039 = vmatprep.subr.mxu1 %v1520_v45 }
 0xa60   :  { %v1493_v15 = vpop.permute.xlu0 %1492 }
 0xa61   :  { %v1508_v20 = vsel %vm27_vm0, %v1506_v17, %v1493_v15  ;;  %v1753_v15 = vld [vmem:[%s2567_s4 + $0x28] sm:$0xff]  ;;  %v1752_v17 = vld [vmem:[%s2567_s4 + $0x20] sm:$0xff] }
 0xa62   :  { %v2149_v60 = vpop.eup %2148 }
 0xa63   :  { %v1327_v61 = vmul.f32 %v2149_v60, %v2145_v54 }
 0xa65   :  { %2032 = vmatmul.mubr.msk.f32.vlgmr.msra.gmra.mxu1 %vm315_vm3, %v1327_v61 }
 0xa66   :  { %v2151_v62 = vpop.eup %2150  ;;  %2040 = vmatpush3.msra.mxu1 %v1520_v45 }
 0xa67   :  { %v1329_v63 = vmul.f32 %v2151_v62, %v2147_v55  ;;  %2041 = vmatprep.subr.mxu1 %v1519_v2  ;;  %v1646_v62 = vrot.slane %v2280_v32, %v1645_v58 }
 0xa68   :  { %2042 = vmatpush3.msra.mxu1 %v1519_v2 }
 0xa69   :  { %2037 = vmatmul.mubr.msk.f32.vlgmr.msra.gmra.mxu0 %vm315_vm3, %v1329_v63  ;;  %2043 = vmatprep.subr.mxu1 %v1518_v3 }
 0xa6a   :  { %2044 = vmatpush3.msra.mxu1 %v1518_v3  ;;  %2059 = vmatpush3.msra.mxu0 %v1652_v18 }
 0xa6b   :  { %2045 = vmatprep.subr.mxu1 %v1517_v4  ;;  %2060 = vmatprep.subr.mxu0 %v1651_v48 }
 0xa6c   :  { %2046 = vmatpush3.msra.mxu1 %v1517_v4  ;;  %2061 = vmatpush3.msra.mxu0 %v1651_v48 }
 0xa6d   :  { %2047 = vmatprep.subr.mxu1 %v1516_v5  ;;  %2062 = vmatprep.subr.mxu0 %v1650_v49 }
 0xa6e   :  { %2048 = vmatpush3.msra.mxu1 %v1516_v5  ;;  %2063 = vmatpush3.msra.mxu0 %v1650_v49 }
 0xa6f   :  { %2049 = vmatprep.subr.mxu1 %v1515_v6  ;;  %2064 = vmatprep.subr.mxu0 %v1649_v50 }
 0xa70   :  { %2050 = vmatpush3.msra.mxu1 %v1515_v6  ;;  %2065 = vmatpush3.msra.mxu0 %v1649_v50  ;;  %v1762_v6 = vld [vmem:[%s2567_s4 + $0x70] sm:$0xff] }
 0xa71   :  { %2051 = vmatprep.subr.mxu1 %v1514_v7  ;;  %2069 = vmatprep.subr.mxu0 %v1763_v51 }
 0xa72   :  { %2052 = vmatpush3.msra.mxu1 %v1514_v7  ;;  %v1761_v7 = vld [vmem:[%s2567_s4 + $0x68] sm:$0xff] }
 0xa73   :  { %2053 = vmatprep.subr.mxu1 %v1513_v8 }
 0xa74   :  { %2054 = vmatpush3.msra.mxu1 %v1513_v8  ;;  %v1760_v8 = vld [vmem:[%s2567_s4 + $0x60] sm:$0xff] }
 0xb25   :  { %v1402_v9 = vpop.f32.mrf.mxu1 }
 0xb26   :  { %1500 = vrot.lane.b32.xlu0 %v1402_v9, %s2185_s17  ;;  %v1759_v9 = vld [vmem:[%s2567_s4 + $0x58] sm:$0xff] }
 0xb27   :  { %v2033_v10 = vpop.f32.mrf.mxu1 }
 0xb28   :  { %v1758_v10 = vld [vmem:[%s2567_s4 + $0x50] sm:$0xff] }
 0xb29   :  { %v1478_v11 = vpop.f32.mrf.mxu0 }
 0xb2a   :  { %1502 = vrot.lane.b32.xlu1 %v1478_v11, %s2185_s17  ;;  %v1757_v11 = vld [vmem:[%s2567_s4 + $0x48] sm:$0xff] }
 0xb2b   :  { %v2038_v12 = vpop.f32.mrf.mxu0 }
 0xb2c   :  { %v1756_v12 = vld [vmem:[%s2567_s4 + $0x40] sm:$0xff] }
 0xb98   :  { %v1501_v21 = vpop.permute.xlu0 %1500 }
 0xb99   :  { %v1511_v22 = vsel %vm1510_vm4, %v1508_v20, %v1501_v21  ;;  %v1750_v20 = vld [vmem:[%s2567_s4 + $0x10] sm:$0xff]  ;;  %v1749_v21 = vld [vmem:[%s2567_s4 + $0x8] sm:$0xff] }
 0xb9a   :  { %2055 = vmatprep.mubr.msk.f32.mxu1 %vm1521_vm5, %v1511_v22  ;;  %v1748_v22 = vld [vmem:[%s2567_s4] sm:$0xff]  ;;  %s2191_s4 = smov [#allocation2]  }
 0xb9b   :  { %s1852_s21 = sshll.u32 %s2191_s4, 4  ;;  %s1853_s21 = int_to_ptr.vmem [resolvable:$true] %s1852_s21 }
 0xb9c   :  { %v1503_v25 = vpop.permute.xlu1 %1502  ;;  %s2160_s22 = scalar_lea.vmem %s1853_s21, 256  ;;  %p2165_p1 = scmp.lt.s32.totalorder %s1853_s21, %s1853_s21 }
 0xb9d   :  { %v1512_v26 = vsel %vm1510_vm4, %v1509_v24, %v1503_v25  ;;  %v1656_v24 = vrot.slane %v2280_v32, %v1655_v23  ;;  %p2161_p0 = scmp.ne.s32.totalorder %s1853_s21, %s2160_s22  ;;  %p2166_p2 = scmp.lt.s32.totalorder %s2160_s22, %s2160_s22 }
 0xb9e   :  { %2056 = vmatmul.mubr.msk.f32.vlgmr.msra.gmra.mxu1 %vm1521_vm5, %v1512_v26 }
 0xb9f   :  { %p2167_p3 = por %p2166_p2, %p2165_p1 }
 0xba1   :  { %p2168_p4 = pnand %p2167_p3, %p2161_p0 }
 0xc5e   :  { %v2057_v16 = vpop.f32.mrf.mxu1 }
 0xc5f   :  { %v1604_v44 = vadd.f32 %v2057_v16, %v2237_v1 }
 0xc60   :  { %v1594_v29 = vpop.f32.mrf.mxu1 }
 0xc61   :  { %v2473_v31 = vadd.f32 %v1608_v28, %v1604_v44  ;;  %v1603_v33 = vadd.f32 %v1594_v29, %v2232_v0 }
 0xc63   :  { %v2476_v34 = vadd.f32 %v1608_v28, %v1603_v33  ;;  %v1614_v19 = vsel %vm27_vm0, %v2473_v31, 0.0 }
 0xc64   :  { %1615 = vadd.xlane.f32.xlu1 %v1614_v19 }
 0xc65   :  { %v1611_v35 = vsel %vm27_vm0, %v2476_v34, 0.0 }
 0xc66   :  { %1612 = vadd.xlane.f32.xlu0 %v1611_v35 }
 0xced   :  { %v1616_v36 = vpop.xlane.xlu1 %1615 }
 0xcee   :  { %v1618_v37 = vmul.f32 0.03125, %v1616_v36 }
 0xcef   :  { %v1613_v38 = vpop.xlane.xlu0 %1612 }
 0xcf0   :  { %v1617_v39 = vmul.f32 0.03125, %v1613_v38  ;;  %v1620_v1 = vsub.f32 %v2473_v31, %v1618_v37 }
 0xcf2   :  { %v1619_v40 = vsub.f32 %v2476_v34, %v1617_v39  ;;  %v1622_v42 = vmul.f32 %v1620_v1, %v1620_v1 }
 0xcf4   :  { %v1621_v41 = vmul.f32 %v1619_v40, %v1619_v40  ;;  %v1626_v43 = vsel %vm27_vm0, %v1622_v42, 0.0 }
 0xcf6   :  { %v1623_v0 = vsel %vm27_vm0, %v1621_v41, 0.0 }
 0xcf7   :  { %1624 = vadd.xlane.f32.xlu0 %v1623_v0 }
 0xcfb   :  { %1627 = vadd.xlane.f32.xlu0 %v1626_v43 }
 0xd80   :  { %v1625_v52 = vpop.xlane.xlu0 %1624 }
 0xd81   :  { %v1629_v53 = vmul.f32 0.03125, %v1625_v52 }
 0xd83   :  { %v1631_v54 = vadd.f32 1e-05, %v1629_v53 }
 0xd84   :  { %v1628_v47 = vpop.xlane.xlu0 %1627 }
 0xd85   :  { %2152 = vrsqrt.f32 %v1631_v54  ;;  %v1630_v55 = vmul.f32 0.03125, %v1628_v47 }
 0xd87   :  { %v1632_v56 = vadd.f32 1e-05, %v1630_v55 }
 0xd89   :  { %2154 = vrsqrt.f32 %v1632_v56 }
 0xd92   :  { %v2153_v60 = vpop.eup %2152 }
 0xd93   :  { %v1635_v61 = vmul.f32 %v2153_v60, %v1619_v40 }
 0xd95   :  { %v1641_v63 = vmul.f32 %v1640_v59, %v1635_v61 }
 0xd96   :  { %v2155_v45 = vpop.eup %2154 }
 0xd97   :  { %v1636_v2 = vmul.f32 %v2155_v45, %v1620_v1  ;;  %v1647_v3 = vadd.f32 %v1646_v62, %v1641_v63  ;;  %v1766_v1 = vsub.s32 5, %v2274_v30 }
 0xd99   :  { %v1642_v4 = vmul.f32 %v1640_v59, %v1636_v2  ;;  %2066 = vmatprep.mubr.msk.f32.mxu0 %vm27_vm0, %v1647_v3  ;;  %v1767_v40 = vrot.slane %v2280_v32, %v1766_v1 }
 0xd9b   :  { %v1648_v5 = vadd.f32 %v1646_v62, %v1642_v4 }
 0xd9d   :  { %2067 = vmatmul.mubr.msk.f32.vlgmr.msra.gmra.mxu0 %vm27_vm0, %v1648_v5 }
 0xd9e   :  { %2070 = vmatpush3.msra.mxu0 %v1763_v51 }
 0xd9f   :  { %2071 = vmatprep.subr.mxu0 %v1762_v6 }
 0xda0   :  { %2072 = vmatpush3.msra.mxu0 %v1762_v6 }
 0xda1   :  { %2073 = vmatprep.subr.mxu0 %v1761_v7 }
 0xda2   :  { %2074 = vmatpush3.msra.mxu0 %v1761_v7 }
 0xda3   :  { %2075 = vmatprep.subr.mxu0 %v1760_v8 }
 0xda4   :  { %2076 = vmatpush3.msra.mxu0 %v1760_v8 }
 0xda5   :  { %2077 = vmatprep.subr.mxu0 %v1759_v9 }
 0xda6   :  { %2078 = vmatpush3.msra.mxu0 %v1759_v9 }
 0xda7   :  { %2079 = vmatprep.subr.mxu0 %v1758_v10 }
 0xda8   :  { %2080 = vmatpush3.msra.mxu0 %v1758_v10 }
 0xda9   :  { %2081 = vmatprep.subr.mxu0 %v1757_v11 }
 0xdaa   :  { %2082 = vmatpush3.msra.mxu0 %v1757_v11 }
 0xdab   :  { %2083 = vmatprep.subr.mxu0 %v1756_v12 }
 0xdac   :  { %2084 = vmatpush3.msra.mxu0 %v1756_v12 }
 0xdad   :  { %2085 = vmatprep.subr.mxu0 %v1755_v13 }
 0xdae   :  { %2086 = vmatpush3.msra.mxu0 %v1755_v13 }
 0xdaf   :  { %2087 = vmatprep.subr.mxu0 %v1754_v14 }
 0xdb0   :  { %2088 = vmatpush3.msra.mxu0 %v1754_v14 }
 0xdb1   :  { %2089 = vmatprep.subr.mxu0 %v1753_v15 }
 0xdb2   :  { %2090 = vmatpush3.msra.mxu0 %v1753_v15 }
 0xdb3   :  { %2091 = vmatprep.subr.mxu0 %v1752_v17 }
 0xdb4   :  { %2092 = vmatpush3.msra.mxu0 %v1752_v17 }
 0xdb5   :  { %2093 = vmatprep.subr.mxu0 %v1751_v46 }
 0xdb6   :  { %2094 = vmatpush3.msra.mxu0 %v1751_v46 }
 0xdb7   :  { %2095 = vmatprep.subr.mxu0 %v1750_v20 }
 0xdb8   :  { %2096 = vmatpush3.msra.mxu0 %v1750_v20 }
 0xdb9   :  { %2097 = vmatprep.subr.mxu0 %v1749_v21 }
 0xdba   :  { %2098 = vmatpush3.msra.mxu0 %v1749_v21 }
 0xdbb   :  { %2099 = vmatprep.subr.mxu0 %v1748_v22 }
 0xdbc   :  { %2100 = vmatpush3.msra.mxu0 %v1748_v22 }
 0xe5d   :  { %v2068_v25 = vpop.f32.mrf.mxu0 }
 0xe5e   :  { %v1735_v26 = vadd.f32 %v2068_v25, %v1656_v24 }
 0xe5f   :  { %v1729_v27 = vpop.f32.mrf.mxu0 }
 0xe60   :  { %v1741_v28 = vmul.f32 0.70710677, %v1735_v26  ;;  %v1730_v16 = vadd.f32 %v1729_v27, %v1656_v24  ;;  %v1739_v37 = vmul.f32 0.5, %v1735_v26 }
 0xe62   :  { %2156 = verf.f32 %v1741_v28  ;;  %v1740_v44 = vmul.f32 0.70710677, %v1730_v16  ;;  %v1738_v35 = vmul.f32 0.5, %v1730_v16 }
 0xe64   :  { %2158 = verf.f32 %v1740_v44 }
 0xe6f   :  { %v2157_v29 = vpop.eup %2156 }
 0xe70   :  { %v1745_v19 = vadd.f32 1.0, %v2157_v29 }
 0xe71   :  { %v2159_v33 = vpop.eup %2158 }
 0xe72   :  { %v1744_v36 = vadd.f32 1.0, %v2159_v33  ;;  %v1747_v39 = vmul.f32 %v1745_v19, %v1739_v37 }
 0xe74   :  { %v1746_v38 = vmul.f32 %v1744_v36, %v1738_v35 }
 0xe76   :  { %2101 = vmatprep.mubr.f32.mxu0 %v1746_v38 }
 0xe77   :  { %2102 = vmatmul.mubr.f32.vlgmr.msra.gmra.mxu0 %v1747_v39 }
 0xf37   :  { %v2103_v41 = vpop.f32.mrf.mxu0 }
 0xf38   :  { %v1840_v0 = vadd.f32 %v2103_v41, %v1767_v40 }
 0xf39   :  { %v1834_v42 = vpop.f32.mrf.mxu0 }
 0xf3a   :  { %v1844_v43 = vadd.f32 %v1840_v0, %v2473_v31  ;;  %v1835_v18 = vadd.f32 %v1834_v42, %v1767_v40 }
 0xf3c   :  { %1846 = vst.msk [vmem:[#allocation2 + $0x8] sm:$0xff] %vm27_vm0, %v1844_v43  ;;  %v1843_v48 = vadd.f32 %v1835_v18, %v2476_v34 }
 0xf3e   :  { %1845 = vst.msk [vmem:[#allocation2] sm:$0xff] %vm27_vm0, %v1843_v48 }
 0xf3f   :  { %2171 = shalt.err (!%p2168_p4)
}
 0xf40   :  { %s2192_s23 = smov 128   ;;  %s2193_s24 = smov 8  }
 0xf41   :  { %1858 = dma.vmem_to_hbm [thread:$0]  %s1853_s21, 256, %s2569_s6, [#allocation3], %s2192_s23, %s2192_s23, %s2193_s24  }
 0xf42   :  { %2180 = dma.done.wait [#allocation3], 256  }
 0xf43   :  { %2181 = vsyncadd [#allocation3], 4294967040 }
 0xf44   :  { %1862 = vsyncpa [#allocation3], 1 }

</bundles_post_ra>
